<compile_context>
chip_gen: v5e
topology: v5e:2x2
jax: 0.10.0
libtpu: 0.0.40
codegen_flags: <defaults>
</compile_context>

<pallas_src>
import jax
import jax.numpy as jnp
from jax.experimental import pallas as pl
from jax.experimental.pallas import tpu as pltpu


BN_EPS = 1e-5


def regression_mlp_kernel(x_ref, w1_ref, p_ref, b2_ref, o_ref):
    g, n, d = x_ref.shape
    rows = g * n

    # ---- fc1 on the MXU: one fused (G*N, D) @ (D, D) matmul per step ----
    # (bias folded away: cancelled exactly by training-mode BatchNorm)
    x = x_ref[...].reshape(rows, d)
    h = jnp.dot(x, w1_ref[...], preferred_element_type=jnp.float32)   # f32

    # ---- packed parameters: gamma / beta / fc2 weight row ----
    p = p_ref[...]                      # (3, D) f32, VMEM-resident
    gamma, beta, w2 = p[0:1], p[1:2], p[2:3]        # each (1, D)

    # ---- BatchNorm1d, training mode: per-batch stats, centered variance ----
    hb = h.reshape(g, n, d)                                   # (G, N, D)
    mean = jnp.mean(hb, axis=1, keepdims=True)                # (G, 1, D)
    c = hb - mean
    var = jnp.mean(c * c, axis=1, keepdims=True)              # biased, stable
    scale = gamma * jax.lax.rsqrt(var + BN_EPS)               # (G, 1, D)

    # ---- ReLU ----
    y = jnp.maximum(c * scale + beta, 0.0)                    # (G, N, D)

    # ---- fc2 (out width 1): VPU multiply + lane reduction, lane-dense store ----
    out = jnp.sum(y.reshape(rows, d) * w2, axis=-1) + b2_ref[0, 0]   # (rows,)
    o_ref[0, 0, :] = out.astype(o_ref.dtype)


def regression_mlp(x, w1, gamma, beta, w2_row, b2, *,
                   matmul_dtype=jnp.bfloat16, rows_per_step=512):
    """RegressionMLP forward over B independent batches.

    Args:
      x:      (B, N, D) inputs; each (N, D) slice is one BatchNorm batch.
      w1:     (D, D)    fc1 weight, pre-transposed to (D_in, D_out).
      gamma:  (1, D)    BatchNorm1d weight.
      beta:   (1, D)    BatchNorm1d bias.
      w2_row: (1, D)    fc2 weight in PyTorch layout (out_features=1 row).
      b2:     scalar / (1,) / (1, 1) fc2 bias.
      matmul_dtype: dtype for the fc1 MXU matmul inputs (default bf16 on all
        TPU generations; halves x/W1 DMA bytes).  BN/ReLU/fc2 math stays f32.
        Pass None to keep the matmul in f32.
      rows_per_step: cap on fused rows (G*N) per grid step, bounding the live
        f32 working set (h / y) so large problems stay out of the spill regime.

    Returns: (B, N) float32.
    """
    b, n, d = x.shape
    if matmul_dtype is not None:
        x = x.astype(matmul_dtype)
        w1 = w1.astype(matmul_dtype)

    # Pack gamma / beta / fc2 weight into one resident parameter slab.
    params = jnp.concatenate([gamma, beta, w2_row], axis=0).astype(jnp.float32)
    b2 = jnp.asarray(b2, jnp.float32).reshape(1, 1)

    # How many (N, D) batches to fuse per grid step: as many as possible,
    # subject to dividing B and the working-set cap, so the fc1 matmul gets an
    # MXU-sized tile and per-step overhead is amortized.  (On v7x, once B is
    # large, an even number of steps keeps both TensorCores busy.)
    g = 1
    for cand in range(1, b + 1):
        if b % cand == 0 and cand * n <= max(rows_per_step, n):
            g = cand
    steps = b // g
    rows = g * n

    out = pl.pallas_call(
        regression_mlp_kernel,
        out_shape=jax.ShapeDtypeStruct((steps, 1, rows), jnp.float32),
        grid=(steps,),
        in_specs=[
            pl.BlockSpec((g, n, d), lambda i: (i, 0, 0)),        # x: G batches/step
            pl.BlockSpec((d, d), lambda i: (0, 0)),              # w1: VMEM-resident
            pl.BlockSpec((3, d), lambda i: (0, 0)),              # gamma/beta/w2 slab
            pl.BlockSpec(memory_space=pltpu.MemorySpace.SMEM),   # b2 scalar
        ],
        out_specs=pl.BlockSpec((1, 1, rows), lambda i: (i, 0, 0)),  # lane-dense
        compiler_params=pltpu.CompilerParams(
            dimension_semantics=("parallel",),        # v7x: shard steps over TCs
            vmem_limit_bytes=64 * 1024 * 1024,        # budget for v7x's 64 MiB VMEM
        ),
    )(x, w1, params, b2)
    return out.reshape(b, n)


def init_params(key, d):
    """Deterministic synthetic parameters matching the PyTorch module shapes."""
    k1, k2, k3, k4 = jax.random.split(key, 4)
    bound = 1.0 / jnp.sqrt(jnp.float32(d))
    # fc1: weight (D, D) stored pre-transposed (D_in, D_out); bias (1, D)
    w1 = jax.random.uniform(k1, (d, d), jnp.float32, -bound, bound)
    b1 = jax.random.uniform(k2, (1, d), jnp.float32, -bound, bound)
    # fc2: PyTorch weight layout (1, D), bias (1, 1)
    w2_row = jax.random.uniform(k3, (1, d), jnp.float32, -bound, bound)
    b2 = jax.random.uniform(k4, (1, 1), jnp.float32, -bound, bound)
    # BatchNorm1d affine params: gamma=1, beta=0 (PyTorch default init)
    gamma = jnp.ones((1, d), jnp.float32)
    beta = jnp.zeros((1, d), jnp.float32)
    return dict(w1=w1, b1=b1, gamma=gamma, beta=beta, w2_row=w2_row, b2=b2)


def reference_forward(x_b, p):
    """Pure-JAX per-batch reference matching PyTorch exactly (b1 included)."""
    h = x_b @ p["w1"] + p["b1"]
    mean = jnp.mean(h, axis=0, keepdims=True)
    var = jnp.mean((h - mean) ** 2, axis=0, keepdims=True)
    y = jnp.maximum(
        p["gamma"] * (h - mean) / jnp.sqrt(var + BN_EPS) + p["beta"], 0.0)
    return (y @ p["w2_row"].T + p["b2"][0, 0])[:, 0]   # (N,)


if __name__ == "__main__":
    B, N, D = 4, 8, 32   # 4 independent batches of (batch=8, input_shape=32)
    key = jax.random.PRNGKey(0)
    kx, kp = jax.random.split(key)
    x = jax.random.normal(kx, (B, N, D), jnp.float32)
    params = init_params(kp, D)

    ref = jnp.stack([reference_forward(x[i], params) for i in range(B)])

    # f32 matmul path: must match the PyTorch-equivalent reference tightly
    # (also proves the b1 elision is exact).
    out_f32 = regression_mlp(x, params["w1"], params["gamma"], params["beta"],
                             params["w2_row"], params["b2"], matmul_dtype=None)
    out_f32 = jax.block_until_ready(out_f32)
    assert out_f32.shape == (B, N)
    assert jnp.allclose(out_f32, ref, atol=1e-4, rtol=1e-4), \
        float(jnp.max(jnp.abs(out_f32 - ref)))

    # Default bf16-matmul path (faster fc1 on v5e/v6e/v7x); BN / ReLU / fc2
    # stay f32, so only a small quantization error vs the f32 reference.
    out_bf16 = regression_mlp(x, params["w1"], params["gamma"], params["beta"],
                              params["w2_row"], params["b2"])
    out_bf16 = jax.block_until_ready(out_bf16)
    assert out_bf16.shape == (B, N)
    assert jnp.allclose(out_bf16, ref, atol=3e-2, rtol=3e-2), \
        float(jnp.max(jnp.abs(out_bf16 - ref)))

    print("KERNEL_OK")
</pallas_src>

<mosaic_0001>
module attributes {stable_mosaic.version = 11 : i64} {
  func.func @regression_mlp_kernel(%arg0: i32, %arg1: memref<4x8x32xf32, #tpu.memory_space<vmem>>, %arg2: memref<32x32xf32, #tpu.memory_space<vmem>>, %arg3: memref<3x32xf32, #tpu.memory_space<vmem>>, %arg4: memref<1x1xf32, #tpu.memory_space<smem>>, %arg5: memref<1x1x32xf32, #tpu.memory_space<vmem>>) attributes {dimension_semantics = [#tpu.dimension_semantics<parallel>], iteration_bounds = array<i64: 1>, scalar_prefetch = 0 : i64, scratch_operands = 0 : i64, tpu.core_type = #tpu.core_type<tc>, window_params = [{transform_indices = @transform_0, window_bounds = array<i64: 4, 8, 32>}, {pipeline_mode = #tpu.pipeline_mode<synchronous>, transform_indices = @transform_1, window_bounds = array<i64: 32, 32>}, {pipeline_mode = #tpu.pipeline_mode<synchronous>, transform_indices = @transform_2, window_bounds = array<i64: 3, 32>}, {transform_indices = @transform_3, window_bounds = array<i64: 1, 1>}, {transform_indices = @transform_4, window_bounds = array<i64: 1, 1, 32>}]} {
    %c0 = arith.constant 0 : index
    %c0_0 = arith.constant 0 : index
    %c0_1 = arith.constant 0 : index
    %0 = vector.load %arg1[%c0, %c0_0, %c0_1] : memref<4x8x32xf32, #tpu.memory_space<vmem>>, vector<4x8x32xf32>
    %1 = vector.shape_cast %0 : vector<4x8x32xf32> to vector<32x32xf32>
    %c0_2 = arith.constant 0 : index
    %c0_3 = arith.constant 0 : index
    %2 = vector.load %arg2[%c0_2, %c0_3] : memref<32x32xf32, #tpu.memory_space<vmem>>, vector<32x32xf32>
    %cst = arith.constant dense<0.000000e+00> : vector<32x32xf32>
    %3 = tpu.matmul %1, %2, %cst {dimension_numbers = #tpu.dot_dimension_numbers<[1], [0], [0], [1], [0, 0, 1, 1], [], []>} : vector<32x32xf32>, vector<32x32xf32>, vector<32x32xf32> -> vector<32x32xf32>
    %c0_4 = arith.constant 0 : index
    %c0_5 = arith.constant 0 : index
    %4 = vector.load %arg3[%c0_4, %c0_5] : memref<3x32xf32, #tpu.memory_space<vmem>>, vector<3x32xf32>
    %5 = vector.extract_strided_slice %4 {offsets = [0, 0], sizes = [1, 32], strides = [1, 1]} : vector<3x32xf32> to vector<1x32xf32>
    %6 = vector.extract_strided_slice %4 {offsets = [1, 0], sizes = [1, 32], strides = [1, 1]} : vector<3x32xf32> to vector<1x32xf32>
    %7 = vector.extract_strided_slice %4 {offsets = [2, 0], sizes = [1, 32], strides = [1, 1]} : vector<3x32xf32> to vector<1x32xf32>
    %8 = vector.shape_cast %3 : vector<32x32xf32> to vector<4x8x32xf32>
    %cst_6 = arith.constant dense<0.000000e+00> : vector<4x32xf32>
    %9 = vector.multi_reduction <add>, %8, %cst_6 [1] : vector<4x8x32xf32> to vector<4x32xf32>
    %10 = vector.shape_cast %9 : vector<4x32xf32> to vector<4x1x32xf32>
    %cst_7 = arith.constant 8.000000e+00 : f32
    %11 = vector.broadcast %cst_7 : f32 to vector<4x1x32xf32>
    %12 = arith.divf %10, %11 : vector<4x1x32xf32>
    %13 = vector.broadcast %12 : vector<4x1x32xf32> to vector<4x8x32xf32>
    %14 = arith.subf %8, %13 : vector<4x8x32xf32>
    %15 = arith.mulf %14, %14 : vector<4x8x32xf32>
    %cst_8 = arith.constant dense<0.000000e+00> : vector<4x32xf32>
    %16 = vector.multi_reduction <add>, %15, %cst_8 [1] : vector<4x8x32xf32> to vector<4x32xf32>
    %17 = vector.shape_cast %16 : vector<4x32xf32> to vector<4x1x32xf32>
    %cst_9 = arith.constant 8.000000e+00 : f32
    %18 = vector.broadcast %cst_9 : f32 to vector<4x1x32xf32>
    %19 = arith.divf %17, %18 : vector<4x1x32xf32>
    %cst_10 = arith.constant 9.99999974E-6 : f32
    %20 = vector.broadcast %cst_10 : f32 to vector<4x1x32xf32>
    %21 = arith.addf %19, %20 : vector<4x1x32xf32>
    %22 = math.rsqrt %21 : vector<4x1x32xf32>
    %23 = vector.shape_cast %5 : vector<1x32xf32> to vector<1x1x32xf32>
    %24 = vector.broadcast %23 : vector<1x1x32xf32> to vector<4x1x32xf32>
    %25 = arith.mulf %24, %22 : vector<4x1x32xf32>
    %26 = vector.broadcast %25 : vector<4x1x32xf32> to vector<4x8x32xf32>
    %27 = arith.mulf %14, %26 : vector<4x8x32xf32>
    %28 = vector.shape_cast %6 : vector<1x32xf32> to vector<1x1x32xf32>
    %29 = vector.broadcast %28 : vector<1x1x32xf32> to vector<4x8x32xf32>
    %30 = arith.addf %27, %29 : vector<4x8x32xf32>
    %cst_11 = arith.constant 0.000000e+00 : f32
    %31 = vector.broadcast %cst_11 : f32 to vector<4x8x32xf32>
    %32 = arith.maximumf %30, %31 : vector<4x8x32xf32>
    %33 = vector.shape_cast %32 : vector<4x8x32xf32> to vector<32x32xf32>
    %34 = vector.broadcast %7 : vector<1x32xf32> to vector<32x32xf32>
    %35 = arith.mulf %33, %34 : vector<32x32xf32>
    %cst_12 = arith.constant dense<0.000000e+00> : vector<32xf32>
    %36 = vector.multi_reduction <add>, %35, %cst_12 [1] : vector<32x32xf32> to vector<32xf32>
    %c0_13 = arith.constant 0 : index
    %c0_14 = arith.constant 0 : index
    %37 = memref.load %arg4[%c0_13, %c0_14] : memref<1x1xf32, #tpu.memory_space<smem>>
    %38 = vector.broadcast %37 : f32 to vector<32xf32>
    %39 = arith.addf %36, %38 : vector<32xf32>
    %c0_15 = arith.constant 0 : index
    %c0_16 = arith.constant 0 : index
    %c0_17 = arith.constant 0 : index
    %40 = vector.load %arg5[%c0_15, %c0_16, %c0_17] : memref<1x1x32xf32, #tpu.memory_space<vmem>>, vector<1x1x32xf32>
    %41 = vector.shape_cast %40 : vector<1x1x32xf32> to vector<32xf32>
    %42 = vector.shape_cast %39 : vector<32xf32> to vector<1x1x32xf32>
    tpu.vector_store %arg5[%c0_15, %c0_16, %c0_17], %42 {strides = array<i32>} : memref<1x1x32xf32, #tpu.memory_space<vmem>>, vector<1x1x32xf32>,
    return
  }
  func.func @transform_0(%arg0: i32) -> (i32, i32, i32) {
    %c0_i32 = arith.constant 0 : i32
    %c0_i32_0 = arith.constant 0 : i32
    %c0_i32_1 = arith.constant 0 : i32
    return %arg0, %c0_i32, %c0_i32_0 : i32, i32, i32
  }
  func.func @transform_1(%arg0: i32) -> (i32, i32) {
    %c0_i32 = arith.constant 0 : i32
    %c0_i32_0 = arith.constant 0 : i32
    %c0_i32_1 = arith.constant 0 : i32
    return %c0_i32, %c0_i32_0 : i32, i32
  }
  func.func @transform_2(%arg0: i32) -> (i32, i32) {
    %c0_i32 = arith.constant 0 : i32
    %c0_i32_0 = arith.constant 0 : i32
    %c0_i32_1 = arith.constant 0 : i32
    return %c0_i32, %c0_i32_0 : i32, i32
  }
  func.func @transform_3(%arg0: i32) -> (i32, i32) {
    %c0_i32 = arith.constant 0 : i32
    %c0_i32_0 = arith.constant 0 : i32
    %c0_i32_1 = arith.constant 0 : i32
    return %c0_i32, %c0_i32_0 : i32, i32
  }
  func.func @transform_4(%arg0: i32) -> (i32, i32, i32) {
    %c0_i32 = arith.constant 0 : i32
    %c0_i32_0 = arith.constant 0 : i32
    %c0_i32_1 = arith.constant 0 : i32
    return %arg0, %c0_i32, %c0_i32_0 : i32, i32, i32
  }
}

</mosaic_0001>

<bundles_post_ra>
// kernel: tpu_custom_call.1
= control target key start
LH: loop header
LB: loop body
LE: loop exit
PB: predicated region body
PF: predicated region fallthrough
CT: control target
= control target key end

     0   :  { %10 = vsyncpa [#allocation4], 0  ;;  %s540_s0 = inlined_call_operand.hbm [shape: f32[4,8,32], index: 0, kind: input, shape index: {}]   ;;  %s541_s1 = inlined_call_operand.hbm [shape: f32[32,32], index: 1, kind: input, shape index: {}]   ;;  %s542_s2 = inlined_call_operand.hbm [shape: f32[3,32], index: 2, kind: input, shape index: {}]   ;;  %s543_s3 = inlined_call_operand.<no memory space> [shape: f32[1,1], index: 3, kind: input, shape index: {}]   ;;  %s544_s4 = inlined_call_operand.hbm [shape: f32[1,1,32], index: 4, kind: output, shape index: {}]  }
   0x1   :  { %11 = vsyncpa [#allocation7], 0 }
   0x2   :  { %12 = vsyncpa [#allocation5], 0  ;;  %s30_s17 = sshll.u32 %s541_s1, 4  ;;  %s457_s18 = smov [#allocation6]   ;;  %s31_s17 = int_to_ptr.hbm [resolvable:$true] %s30_s17 }
   0x3   :  { %s32_s19 = sshll.u32 %s457_s18, 4  ;;  %s17_s22 = sshll.u32 %s540_s0, 4  ;;  %s33_s19 = int_to_ptr.vmem [resolvable:$true] %s32_s19  ;;  %s18_s22 = int_to_ptr.hbm [resolvable:$true] %s17_s22 }
   0x4   :  { %s458_s23 = smov 128   ;;  %s459_s24 = smov 8  }
   0x5   :  { %38 = dma.hbm_to_vmem [thread:$0]  %s31_s17, 512, %s33_s19, [#allocation7], %s458_s23, %s458_s23, %s459_s24  }
   0x6   :  { %s460_s25 = smov [#allocation3]   ;;  %s44_s29 = sshll.u32 %s542_s2, 4  ;;  %s45_s29 = int_to_ptr.hbm [resolvable:$true] %s44_s29 }
   0x7   :  { %s19_s26 = sshll.u32 %s460_s25, 4  ;;  %s461_s1 = smov [#allocation8]   ;;  %s20_s26 = int_to_ptr.vmem [resolvable:$true] %s19_s26 }
   0x8   :  { %25 = dma.hbm_to_vmem [thread:$0]  %s18_s22, 512, %s20_s26, [#allocation4], %s458_s23, %s458_s23, %s459_s24  }
   0x9   :  { %s46_s30 = sshll.u32 %s461_s1, 4  ;;  %s47_s30 = int_to_ptr.vmem [resolvable:$true] %s46_s30 }
   0xa   :  { %49 = dma.hbm_to_vmem [thread:$0]  %s45_s29, 64, %s47_s30, [#allocation7]  }
   0xb   :  { %451 = dma.done.wait [#allocation4], 512  }
   0xc   :  { %452 = vsyncadd [#allocation4], 4294966784 }
   0xd   :  { %453 = dma.done.wait [#allocation7], 576  }
   0xe   :  { %454 = vsyncadd [#allocation7], 4294966720  ;;  %v71_v0 = vld [vmem:[#allocation6 + $0x18] sm:$0xff]  ;;  %v70_v1 = vld [vmem:[#allocation6 + $0x10] sm:$0xff]  ;;  %vm72_vm0 = vcmask 261120   ;;  %v462_v8 = vmov 8.0  }
   0xf   :  { %97 = vmatpush.msra.mxu0 %v71_v0  ;;  %326 = vmatpush.msra.mxu1 %v71_v0  ;;  %v69_v2 = vld [vmem:[#allocation6 + $0x8] sm:$0xff]  ;;  %v68_v3 = vld [vmem:[#allocation6] sm:$0xff]  ;;  %v66_v6 = vld [vmem:[#allocation3 + $0x10] sm:$0xff]  ;;  %345 = vrcp.f32 %v462_v8  ;;  %vm291_vm14 = vcmask 130112   ;;  %vm295_vm15 = vcmask 195712   ;;  %s463_s5 = smov [#allocation9]  }
  0x10   :  { %327 = vmatpush.msra.mxu2 %v71_v0  ;;  %328 = vmatpush.msra.mxu3 %v71_v0  ;;  %v64_v4 = vld [vmem:[#allocation3] sm:$0xff]  ;;  %v65_v5 = vld [vmem:[#allocation3 + $0x8] sm:$0xff]  ;;  %v67_v7 = vld [vmem:[#allocation3 + $0x18] sm:$0xff]  ;;  %s309_s6 = sshll.u32 %s463_s5, 4  ;;  %s310_s6 = int_to_ptr.vmem [resolvable:$true] %s309_s6 }
  0x11   :  { %98 = vmatpush.msra.mxu0 %v70_v1  ;;  %329 = vmatpush.msra.mxu1 %v70_v1 }
  0x12   :  { %330 = vmatpush.msra.mxu2 %v70_v1  ;;  %331 = vmatpush.msra.mxu3 %v70_v1 }
  0x13   :  { %99 = vmatpush.msra.mxu0 %v69_v2  ;;  %332 = vmatpush.msra.mxu1 %v69_v2 }
  0x14   :  { %333 = vmatpush.msra.mxu2 %v69_v2  ;;  %334 = vmatpush.msra.mxu3 %v69_v2 }
  0x15   :  { %100 = vmatpush.msra.mxu0 %v68_v3  ;;  %335 = vmatpush.msra.mxu1 %v68_v3  ;;  %v346_v9 = vpop.eup %345 }
  0x16   :  { %336 = vmatpush.msra.mxu2 %v68_v3  ;;  %337 = vmatpush.msra.mxu3 %v68_v3  ;;  %v144_v10 = vmul.f32 8.0, %v346_v9  ;;  %vm148_vm1 = vweird.f32 %v346_v9 }
  0x17   :  { %322 = vmatmul.msk.f32.vlgmr.msra.gmra.mxu0 %vm72_vm0, %v64_v4  ;;  %323 = vmatmul.msk.f32.vlgmr.msra.gmra.mxu1 %vm72_vm0, %v65_v5 }
  0x18   :  { %324 = vmatmul.msk.f32.vlgmr.msra.gmra.mxu2 %vm72_vm0, %v66_v6  ;;  %325 = vmatmul.msk.f32.vlgmr.msra.gmra.mxu3 %vm72_vm0, %v67_v7  ;;  %v145_v11 = vsub.f32 1.0, %v144_v10 }
  0x1a   :  { %v146_v18 = vmul.f32 %v346_v9, %v145_v11 }
  0x1c   :  { %v147_v23 = vadd.f32 %v346_v9, %v146_v18 }
  0x1e   :  { %v149_v34 = vsel %vm148_vm1, %v346_v9, %v147_v23  ;;  %vm302_vm1 = vcmask 253952  }
  0x94   :  { %v102_v12 = vpop.f32.mrf.mxu0  ;;  %v105_v13 = vpop.f32.mrf.mxu1 }
  0x95   :  { %v115_v14 = vsel %vm72_vm0, %v102_v12, 0.0  ;;  %v122_v15 = vsel %vm72_vm0, %v105_v13, 0.0 }
  0x96   :  { %v116_v16 = vrot.slane %v115_v14, 4  ;;  %v123_v17 = vrot.slane %v122_v15, 4 }
  0x98   :  { %v117_v19 = vadd.f32 %v116_v16, %v115_v14  ;;  %v124_v20 = vadd.f32 %v123_v17, %v122_v15 }
  0x9a   :  { %v118_v21 = vrot.slane %v117_v19, 2  ;;  %v125_v22 = vrot.slane %v124_v20, 2 }
  0x9b   :  { %v108_v24 = vpop.f32.mrf.mxu2  ;;  %v111_v25 = vpop.f32.mrf.mxu3 }
  0x9c   :  { %v119_v26 = vadd.f32 %v118_v21, %v117_v19  ;;  %v126_v27 = vadd.f32 %v125_v22, %v124_v20  ;;  %v129_v28 = vsel %vm72_vm0, %v108_v24, 0.0  ;;  %v136_v29 = vsel %vm72_vm0, %v111_v25, 0.0 }
  0x9d   :  { %v130_v30 = vrot.slane %v129_v28, 4  ;;  %v137_v31 = vrot.slane %v136_v29, 4 }
  0x9e   :  { %v120_v32 = vrot.slane %v119_v26, 1  ;;  %v127_v33 = vrot.slane %v126_v27, 1 }
  0x9f   :  { %v131_v35 = vadd.f32 %v130_v30, %v129_v28  ;;  %v138_v36 = vadd.f32 %v137_v31, %v136_v29 }
  0xa0   :  { %v121_v37 = vadd.f32 %v120_v32, %v119_v26  ;;  %v128_v38 = vadd.f32 %v127_v33, %v126_v27 }
  0xa1   :  { %v132_v39 = vrot.slane %v131_v35, 2  ;;  %v139_v40 = vrot.slane %v138_v36, 2 }
  0xa2   :  { %v150_v41 = vmul.f32 %v149_v34, %v121_v37  ;;  %v151_v42 = vmul.f32 %v149_v34, %v128_v38 }
  0xa3   :  { %v133_v43 = vadd.f32 %v132_v39, %v131_v35  ;;  %v140_v44 = vadd.f32 %v139_v40, %v138_v36 }
  0xa4   :  { %v506_v45 = vsub.f32 %v102_v12, %v150_v41  ;;  %v508_v46 = vsub.f32 %v105_v13, %v151_v42 }
  0xa5   :  { %v134_v47 = vrot.slane %v133_v43, 1  ;;  %v141_v48 = vrot.slane %v140_v44, 1 }
  0xa6   :  { %v158_v49 = vmul.f32 %v506_v45, %v506_v45  ;;  %v159_v50 = vmul.f32 %v508_v46, %v508_v46 }
  0xa7   :  { %v135_v51 = vadd.f32 %v134_v47, %v133_v43  ;;  %v142_v52 = vadd.f32 %v141_v48, %v140_v44 }
  0xa8   :  { %v162_v53 = vsel %vm72_vm0, %v158_v49, 0.0  ;;  %v169_v54 = vsel %vm72_vm0, %v159_v50, 0.0 }
  0xa9   :  { %v163_v55 = vrot.slane %v162_v53, 4  ;;  %v170_v56 = vrot.slane %v169_v54, 4  ;;  %v152_v57 = vmul.f32 %v149_v34, %v135_v51  ;;  %v153_v58 = vmul.f32 %v149_v34, %v142_v52 }
  0xab   :  { %v164_v59 = vadd.f32 %v163_v55, %v162_v53  ;;  %v171_v60 = vadd.f32 %v170_v56, %v169_v54  ;;  %v516_v61 = vsub.f32 %v108_v24, %v152_v57  ;;  %v518_v62 = vsub.f32 %v111_v25, %v153_v58 }
  0xad   :  { %v165_v63 = vrot.slane %v164_v59, 2  ;;  %v172_v0 = vrot.slane %v171_v60, 2  ;;  %v160_v1 = vmul.f32 %v516_v61, %v516_v61  ;;  %v161_v2 = vmul.f32 %v518_v62, %v518_v62 }
  0xaf   :  { %v166_v3 = vadd.f32 %v165_v63, %v164_v59  ;;  %v173_v4 = vadd.f32 %v172_v0, %v171_v60  ;;  %v176_v5 = vsel %vm72_vm0, %v160_v1, 0.0  ;;  %v183_v6 = vsel %vm72_vm0, %v161_v2, 0.0 }
  0xb0   :  { %v177_v7 = vrot.slane %v176_v5, 4  ;;  %v184_v8 = vrot.slane %v183_v6, 4 }
  0xb1   :  { %v167_v9 = vrot.slane %v166_v3, 1  ;;  %v174_v10 = vrot.slane %v173_v4, 1 }
  0xb2   :  { %v178_v11 = vadd.f32 %v177_v7, %v176_v5  ;;  %v185_v12 = vadd.f32 %v184_v8, %v183_v6 }
  0xb3   :  { %v168_v13 = vadd.f32 %v167_v9, %v166_v3  ;;  %v175_v14 = vadd.f32 %v174_v10, %v173_v4 }
  0xb4   :  { %v179_v15 = vrot.slane %v178_v11, 2  ;;  %v186_v16 = vrot.slane %v185_v12, 2 }
  0xb5   :  { %v190_v17 = vmul.f32 %v168_v13, %v149_v34  ;;  %v191_v18 = vmul.f32 %v175_v14, %v149_v34 }
  0xb6   :  { %v180_v19 = vadd.f32 %v179_v15, %v178_v11  ;;  %v187_v20 = vadd.f32 %v186_v16, %v185_v12 }
  0xb7   :  { %v194_v21 = vadd.f32 1e-05, %v190_v17  ;;  %v195_v22 = vadd.f32 1e-05, %v191_v18 }
  0xb8   :  { %v181_v23 = vrot.slane %v180_v19, 1  ;;  %v188_v24 = vrot.slane %v187_v20, 1 }
  0xb9   :  { %347 = vrsqrt.f32 %v194_v21  ;;  %vm204_vm4 = vweird.f32 %v194_v21  ;;  %vm214_vm6 = vweird.f32 %v195_v22 }
  0xba   :  { %349 = vrsqrt.f32 %v195_v22  ;;  %v182_v25 = vadd.f32 %v181_v23, %v180_v19  ;;  %v189_v26 = vadd.f32 %v188_v24, %v187_v20 }
  0xbc   :  { %v192_v27 = vmul.f32 %v182_v25, %v149_v34  ;;  %v193_v28 = vmul.f32 %v189_v26, %v149_v34  ;;  %v114_v34 = vld [vmem:[#allocation8] sm:$0x7] }
  0xbd   :  { %v250_v59 = vperm.slane %v114_v34, 1  ;;  %v259_v7 = vperm.slane %v114_v34, 2 }
  0xbe   :  { %v196_v29 = vadd.f32 1e-05, %v192_v27  ;;  %v197_v30 = vadd.f32 1e-05, %v193_v28  ;;  %v286_v27 = vlaneseq }
  0xbf   :  { %v348_v31 = vpop.eup %347 }
  0xc0   :  { %v350_v32 = vpop.eup %349  ;;  %v199_v33 = vmul.f32 %v348_v31, %v194_v21  ;;  %351 = vrsqrt.f32 %v196_v29  ;;  %vm205_vm2 = vweird.f32 %v348_v31  ;;  %vm224_vm10 = vweird.f32 %v196_v29 }
  0xc1   :  { %v209_v35 = vmul.f32 %v350_v32, %v195_v22  ;;  %353 = vrsqrt.f32 %v197_v30  ;;  %vm215_vm3 = vweird.f32 %v350_v32  ;;  %vm206_vm5 = vmor %vm204_vm4, %vm205_vm2  ;;  %vm234_vm12 = vweird.f32 %v197_v30 }
  0xc2   :  { %v200_v36 = vmul.f32 %v348_v31, %v199_v33  ;;  %vm216_vm7 = vmor %vm214_vm6, %vm215_vm3  ;;  %v287_v28 = vand.u32 127, %v286_v27 }
  0xc3   :  { %v210_v37 = vmul.f32 %v350_v32, %v209_v35 }
  0xc4   :  { %v201_v38 = vmul.f32 0.5, %v200_v36 }
  0xc5   :  { %v211_v39 = vmul.f32 0.5, %v210_v37  ;;  %v293_v37 = vadd.s32 4294967280, %v287_v28 }
  0xc6   :  { %v352_v40 = vpop.eup %351  ;;  %v202_v41 = vsub.f32 1.5, %v201_v38 }
  0xc7   :  { %v354_v42 = vpop.eup %353  ;;  %v212_v43 = vsub.f32 1.5, %v211_v39  ;;  %v219_v44 = vmul.f32 %v352_v40, %v196_v29  ;;  %vm225_vm8 = vweird.f32 %v352_v40  ;;  %v277_v29 = vstv %s543_s3  ;;  %s311_s3 = sshll.u32 %s544_s4, 4  ;;  %s312_s3 = int_to_ptr.hbm [resolvable:$true] %s311_s3 }
  0xc8   :  { %v203_v47 = vmul.f32 %v348_v31, %v202_v41  ;;  %v229_v48 = vmul.f32 %v354_v42, %v197_v30  ;;  %vm235_vm9 = vweird.f32 %v354_v42  ;;  %vm226_vm11 = vmor %vm224_vm10, %vm225_vm8 }
  0xc9   :  { %v213_v49 = vmul.f32 %v350_v32, %v212_v43  ;;  %v220_v50 = vmul.f32 %v352_v40, %v219_v44  ;;  %vm236_vm13 = vmor %vm234_vm12, %vm235_vm9 }
  0xca   :  { %v207_v51 = vsel %vm206_vm5, %v348_v31, %v203_v47  ;;  %v230_v52 = vmul.f32 %v354_v42, %v229_v48  ;;  %v289_v31 = vadd.s32 4294967288, %v287_v28 }
  0xcb   :  { %v238_v53 = vmul.f32 %v207_v51, %v114_v34  ;;  %v217_v54 = vsel %vm216_vm7, %v350_v32, %v213_v49  ;;  %v221_v55 = vmul.f32 0.5, %v220_v50 }
  0xcc   :  { %v239_v56 = vmul.f32 %v217_v54, %v114_v34  ;;  %v231_v57 = vmul.f32 0.5, %v230_v52 }
  0xcd   :  { %v242_v58 = vperm.slane %v238_v53, 0  ;;  %v222_v60 = vsub.f32 1.5, %v221_v55 }
  0xce   :  { %v243_v63 = vperm.slane %v239_v56, 0  ;;  %v232_v0 = vsub.f32 1.5, %v231_v57 }
  0xcf   :  { %v246_v1 = vmul.f32 %v242_v58, %v506_v45  ;;  %v223_v2 = vmul.f32 %v352_v40, %v222_v60 }
  0xd0   :  { %v247_v3 = vmul.f32 %v243_v63, %v508_v46  ;;  %v233_v4 = vmul.f32 %v354_v42, %v232_v0 }
  0xd1   :  { %v227_v5 = vsel %vm226_vm11, %v352_v40, %v223_v2  ;;  %v251_v6 = vadd.f32 %v250_v59, %v246_v1  ;;  %v297_v40 = vadd.s32 4294967272, %v287_v28 }
  0xd2   :  { %v240_v8 = vmul.f32 %v227_v5, %v114_v34  ;;  %v237_v9 = vsel %vm236_vm13, %v354_v42, %v233_v4  ;;  %v252_v10 = vadd.f32 %v250_v59, %v247_v3 }
  0xd3   :  { %v241_v11 = vmul.f32 %v237_v9, %v114_v34  ;;  %v255_v12 = vmax.f32 %v251_v6, 0.0 }
  0xd4   :  { %v244_v13 = vperm.slane %v240_v8, 0  ;;  %v256_v17 = vmax.f32 %v252_v10, 0.0 }
  0xd5   :  { %v245_v14 = vperm.slane %v241_v11, 0  ;;  %v260_v15 = vmul.f32 %v259_v7, %v255_v12 }
  0xd6   :  { %v248_v45 = vmul.f32 %v244_v13, %v516_v61  ;;  %v261_v21 = vmul.f32 %v259_v7, %v256_v17 }
  0xd7   :  { %v249_v16 = vmul.f32 %v245_v14, %v518_v62  ;;  %v264_v46 = vsel %vm72_vm0, %v260_v15, 0.0 }
  0xd8   :  { %265 = vadd.xlane.f32.xlu0 %v264_v46  ;;  %v253_v18 = vadd.f32 %v250_v59, %v248_v45  ;;  %v267_v25 = vsel %vm72_vm0, %v261_v21, 0.0 }
  0xd9   :  { %v254_v19 = vadd.f32 %v250_v59, %v249_v16 }
  0xda   :  { %v257_v20 = vmax.f32 %v253_v18, 0.0 }
  0xdb   :  { %v258_v24 = vmax.f32 %v254_v19, 0.0 }
  0xdc   :  { %v262_v22 = vmul.f32 %v259_v7, %v257_v20 }
  0xdd   :  { %v263_v26 = vmul.f32 %v259_v7, %v258_v24 }
  0xde   :  { %v270_v23 = vsel %vm72_vm0, %v262_v22, 0.0 }
  0xdf   :  { %271 = vadd.xlane.f32.xlu1 %v270_v23  ;;  %v273_v61 = vsel %vm72_vm0, %v263_v26, 0.0  ;;  %vm299_vm0 = vcmask 261312  }
  0xe0   :  { %268 = vadd.xlane.f32.xlu0 %v267_v25 }
  0xe7   :  { %274 = vadd.xlane.f32.xlu1 %v273_v61 }
 0x14b   :  { %v266_v62 = vpop.xlane.xlu0 %265 }
 0x14c   :  { %v278_v35 = vadd.f32 %v277_v29, %v266_v62 }
 0x14e   :  { %v288_v39 = vperm.slane %v278_v35, %v287_v28 }
 0x152   :  { %v272_v30 = vpop.xlane.xlu1 %271 }
 0x153   :  { %v269_v32 = vpop.xlane.xlu0 %268  ;;  %v280_v38 = vadd.f32 %v277_v29, %v272_v30 }
 0x154   :  { %v279_v33 = vadd.f32 %v277_v29, %v269_v32 }
 0x155   :  { %v294_v44 = vperm.slane %v280_v38, %v293_v37 }
 0x156   :  { %v290_v36 = vperm.slane %v279_v33, %v289_v31 }
 0x158   :  { %v292_v42 = vsel %vm291_vm14, %v290_v36, %v288_v39 }
 0x159   :  { %v296_v47 = vsel %vm295_vm15, %v294_v44, %v292_v42 }
 0x15a   :  { %v275_v41 = vpop.xlane.xlu1 %274 }
 0x15b   :  { %v281_v43 = vadd.f32 %v277_v29, %v275_v41 }
 0x15d   :  { %v298_v34 = vperm.slane %v281_v43, %v297_v40 }
 0x15f   :  { %v300_v48 = vsel %vm299_vm0, %v298_v34, %v296_v47 }
 0x160   :  { %303 = vst.msk [vmem:[#allocation9] sm:$0x1] %vm302_vm1, %v300_v48 }
 0x161   :  { %314 = dma.vmem_to_hbm [thread:$0]  %s310_s6, 16, %s312_s3, [#allocation5]  }
 0x162   :  { %455 = dma.done.wait [#allocation5], 16  }
 0x163   :  { %456 = vsyncadd [#allocation5], 4294967280 }
 0x164   :  { %319 = vsyncpa [#allocation4], 1 }
 0x165   :  { %320 = vsyncpa [#allocation7], 1 }
 0x166   :  { %321 = vsyncpa [#allocation5], 1 }

</bundles_post_ra>
